<compile_context>
chip_gen: v5e
topology: v5e:2x2
jax: 0.10.0
libtpu: 0.0.40
codegen_flags: <defaults>
</compile_context>

<pallas_src>
import jax
import jax.numpy as jnp
from jax.experimental import pallas as pl
from jax.experimental.pallas import tpu as pltpu

GEM_EPS = 1e-6   # GeneralizedMeanPoolingP clamp eps
BN_EPS = 1e-5    # nn.BatchNorm1d default eps


def _make_gem_bn_kernel(p: float, hw_total: int):
    """GeM pooling (exponent baked in at trace time) + folded-BN epilogue."""
    p = float(p)
    inv_hw = 1.0 / float(hw_total)

    def kernel(x_ref, scale_ref, shift_ref, feat_ref, acc_ref):
        # x_ref:     (tile_n, tile_hw, tile_c)  feature-map block, C on lanes
        # scale_ref: (1, tile_c) = gamma * rsqrt(var + eps)
        # shift_ref: (1, tile_c) = beta - mean * scale
        # feat_ref:  (tile_n, tile_c) output block (resident across hw axis)
        # acc_ref:   (tile_n, tile_c) f32 partial-sum scratch
        hw_i = pl.program_id(2)

        @pl.when(hw_i == 0)
        def _init():
            acc_ref[...] = jnp.zeros_like(acc_ref)

        x = x_ref[...].astype(jnp.float32)        # bf16 stream -> f32 math
        xc = jnp.maximum(x, GEM_EPS)              # clamp(min=eps), > 0
        if p == 3.0:
            xp = xc * xc * xc                     # VPU-only fast path
        else:
            xp = jnp.exp(jnp.log(xc) * p)         # generic x^p via EUP
        acc_ref[...] += jnp.sum(xp, axis=1)       # reduce HW (sublane axis)

        @pl.when(hw_i == pl.num_programs(2) - 1)
        def _finalize():
            pooled = acc_ref[...] * inv_hw                       # GeM mean
            g = jnp.exp(jnp.log(pooled) * (1.0 / p))             # p-th root
            feat_ref[...] = (g * scale_ref[...] + shift_ref[...]
                             ).astype(feat_ref.dtype)

    return kernel


def _vmem_capacity_bytes(default=64 * 1024 * 1024):
    try:
        info = pltpu.get_tpu_info()
        return int(getattr(info, "vmem_capacity_bytes", default))
    except Exception:
        return default


def _tile_candidates(total, unit):
    """Valid Pallas tile sizes for one dim, descending: the full extent plus
    every divisor of `total` that is a multiple of `unit`."""
    cands = [total]
    for d in range(total - 1, 0, -1):
        if total % d == 0 and d % unit == 0:
            cands.append(d)
    return cands


def _pick_tiles(n, hw, c, itemsize, budget):
    """Start at full-extent blocks (maximize DMA size / amortize the ~0.35us
    per-grid-step overhead) and shrink N, then HW, then C until the input
    block fits the per-block VMEM budget."""
    n_c = _tile_candidates(n, 8)
    hw_c = _tile_candidates(hw, 8)
    c_c = _tile_candidates(c, 128)
    ni = hwi = ci = 0

    def blk_bytes():
        return n_c[ni] * hw_c[hwi] * c_c[ci] * itemsize

    while blk_bytes() > budget:
        if ni + 1 < len(n_c):
            ni += 1          # split the batch first (parallel / megacore-friendly)
        elif hwi + 1 < len(hw_c):
            hwi += 1         # then split HW (accumulator axis)
        elif ci + 1 < len(c_c):
            ci += 1          # finally split channels
        else:
            break
    return n_c[ni], hw_c[hwi], c_c[ci]


def model_eval_forward(feature_map_nhwc, params, *, stream_dtype=jnp.bfloat16):
    """Eval path of Model.forward for a backbone feature map in NHWC layout."""
    # TODO(synk): Backbone() is not defined in the reference snippet; it is
    # treated as identity, i.e. the input is already the backbone feature map.
    N, H, W, C = feature_map_nhwc.shape
    HW = H * W
    # NHWC is already C-on-lanes; flattening (H, W) -> HW is a free view.
    feats = feature_map_nhwc.reshape(N, HW, C)
    # Stream in bf16: kernel is HBM-bandwidth bound (~1 flop/byte); f32 math
    # inside.  In production the backbone output would already be bf16.
    if feats.dtype != stream_dtype:
        feats = feats.astype(stream_dtype)

    # Fold eval-mode BatchNorm1d into a single scale/shift (host-side, tiny).
    gamma = jnp.reshape(params["gamma"], (1, C)).astype(jnp.float32)
    beta = jnp.reshape(params["beta"], (1, C)).astype(jnp.float32)
    mean = jnp.reshape(params["mean"], (1, C)).astype(jnp.float32)
    var = jnp.reshape(params["var"], (1, C)).astype(jnp.float32)
    scale = gamma * jax.lax.rsqrt(var + BN_EPS)
    shift = beta - mean * scale

    # Trace-time GeM exponent (Python float) -> specialized kernel.
    p = float(params["p"])

    # ---- tile selection -----------------------------------------------------
    itemsize = jnp.dtype(feats.dtype).itemsize
    vmem_cap = _vmem_capacity_bytes()
    block_budget = vmem_cap // 6           # ~10.6 MiB on v7x, ~21 MiB on v5e/v6e
    tile_n, tile_hw, tile_c = _pick_tiles(N, HW, C, itemsize, block_budget)

    grid = (N // tile_n, C // tile_c, HW // tile_hw)   # reduction axis last

    feat = pl.pallas_call(
        _make_gem_bn_kernel(p, HW),
        out_shape=jax.ShapeDtypeStruct((N, C), jnp.float32),
        grid=grid,
        in_specs=[
            # feature map block: C on lanes, HW on sublanes
            pl.BlockSpec((tile_n, tile_hw, tile_c), lambda i, j, k: (i, k, j)),
            # scale / shift: keyed only on the slow C axis -> DMA'd only when
            # the C block changes, not every grid step
            pl.BlockSpec((1, tile_c), lambda i, j, k: (0, j)),
            pl.BlockSpec((1, tile_c), lambda i, j, k: (0, j)),
        ],
        out_specs=pl.BlockSpec((tile_n, tile_c), lambda i, j, k: (i, j)),
        scratch_shapes=[pltpu.VMEM((tile_n, tile_c), jnp.float32)],
        compiler_params=pltpu.CompilerParams(
            # TODO(synk): on v7x, confirm in the trace that the parallel axes
            # are sharded across both TensorCores; if not, mark the N axis
            # pltpu.CORE_PARALLEL.
            dimension_semantics=("parallel", "parallel", "arbitrary"),
            vmem_limit_bytes=int(vmem_cap * 3 // 4),
        ),
    )(feats, scale, shift)

    # torch .squeeze() -> (N, C) for N > 1 (kept 2-D here even for N == 1);
    # torch.cat([global_bn_features], dim=1) == global_bn_features.
    return feat


if __name__ == "__main__":
    key = jax.random.PRNGKey(0)
    # Small shapes consistent with the module: backbone feature dim C = 32,
    # 16x8 feature map, batch 2.  NHWC layout (C on lanes).
    N, H, W, C = 2, 16, 8, 32

    k1, k2, k3, k4, k5 = jax.random.split(key, 5)
    x = jax.random.normal(k1, (N, H, W, C), jnp.float32)

    params = dict(
        p=3.0,                                                          # GeM p (eval-time constant)
        gamma=1.0 + 0.1 * jax.random.normal(k2, (C,), jnp.float32),     # BN weight
        beta=0.1 * jax.random.normal(k3, (C,), jnp.float32),            # BN bias
        mean=0.1 * jax.random.normal(k4, (C,), jnp.float32),            # running_mean
        var=jnp.abs(jax.random.normal(k5, (C,), jnp.float32)) + 0.5,    # running_var
    )

    out = model_eval_forward(x, params)
    jax.block_until_ready(out)

    # Pure-JAX reference (same bf16 streaming as the kernel, f32 accumulation).
    xr = x.astype(jnp.bfloat16).astype(jnp.float32).reshape(N, H * W, C)
    xc = jnp.maximum(xr, GEM_EPS)
    g = jnp.mean(xc ** 3.0, axis=1) ** (1.0 / 3.0)
    scale = params["gamma"].reshape(1, C) * jax.lax.rsqrt(
        params["var"].reshape(1, C) + BN_EPS)
    shift = params["beta"].reshape(1, C) - params["mean"].reshape(1, C) * scale
    ref = g * scale + shift

    assert out.shape == (N, C)
    assert jnp.allclose(out, ref, atol=2e-3, rtol=2e-3), "mismatch vs reference"

    print("KERNEL_OK")
</pallas_src>

<mosaic_0001>
module attributes {stable_mosaic.version = 11 : i64} {
  func.func @kernel(%arg0: i32, %arg1: i32, %arg2: i32, %arg3: memref<2x128x32xbf16, #tpu.memory_space<vmem>>, %arg4: memref<1x32xf32, #tpu.memory_space<vmem>>, %arg5: memref<1x32xf32, #tpu.memory_space<vmem>>, %arg6: memref<2x32xf32, #tpu.memory_space<vmem>>, %arg7: memref<2x32xf32, #tpu.memory_space<vmem>>) attributes {dimension_semantics = [#tpu.dimension_semantics<parallel>, #tpu.dimension_semantics<parallel>, #tpu.dimension_semantics<arbitrary>], iteration_bounds = array<i64: 1, 1, 1>, scalar_prefetch = 0 : i64, scratch_operands = 1 : i64, tpu.core_type = #tpu.core_type<tc>, window_params = [{transform_indices = @transform_0, window_bounds = array<i64: 2, 128, 32>}, {transform_indices = @transform_1, window_bounds = array<i64: 1, 32>}, {transform_indices = @transform_2, window_bounds = array<i64: 1, 32>}, {transform_indices = @transform_3, window_bounds = array<i64: 2, 32>}]} {
    %c0_i32 = arith.constant 0 : i32
    %0 = arith.cmpi eq, %arg2, %c0_i32 : i32
    %1 = arith.extui %0 : i1 to i32
    %c0_i32_0 = arith.constant 0 : i32
    %2 = arith.cmpi ne, %1, %c0_i32_0 : i32
    scf.if %2 {
      %cst_10 = arith.constant 0.000000e+00 : f32
      %16 = vector.broadcast %cst_10 : f32 to vector<2x32xf32>
      %c0_11 = arith.constant 0 : index
      %c0_12 = arith.constant 0 : index
      %17 = vector.load %arg7[%c0_11, %c0_12] : memref<2x32xf32, #tpu.memory_space<vmem>>, vector<2x32xf32>
      tpu.vector_store %arg7[%c0_11, %c0_12], %16 {strides = array<i32>} : memref<2x32xf32, #tpu.memory_space<vmem>>, vector<2x32xf32>,
    } else {
    }
    %c0 = arith.constant 0 : index
    %c0_1 = arith.constant 0 : index
    %c0_2 = arith.constant 0 : index
    %3 = vector.load %arg3[%c0, %c0_1, %c0_2] : memref<2x128x32xbf16, #tpu.memory_space<vmem>>, vector<2x128x32xbf16>
    %4 = arith.extf %3 : vector<2x128x32xbf16> to vector<2x128x32xf32>
    %cst = arith.constant 9.99999997E-7 : f32
    %5 = vector.broadcast %cst : f32 to vector<2x128x32xf32>
    %6 = arith.maximumf %4, %5 : vector<2x128x32xf32>
    %7 = arith.mulf %6, %6 : vector<2x128x32xf32>
    %8 = arith.mulf %7, %6 : vector<2x128x32xf32>
    %c0_3 = arith.constant 0 : index
    %c0_4 = arith.constant 0 : index
    %9 = vector.load %arg7[%c0_3, %c0_4] : memref<2x32xf32, #tpu.memory_space<vmem>>, vector<2x32xf32>
    %cst_5 = arith.constant dense<0.000000e+00> : vector<2x32xf32>
    %10 = vector.multi_reduction <add>, %8, %cst_5 [1] : vector<2x128x32xf32> to vector<2x32xf32>
    %11 = arith.addf %9, %10 : vector<2x32xf32>
    %c0_6 = arith.constant 0 : index
    %c0_7 = arith.constant 0 : index
    %12 = vector.load %arg7[%c0_6, %c0_7] : memref<2x32xf32, #tpu.memory_space<vmem>>, vector<2x32xf32>
    tpu.vector_store %arg7[%c0_6, %c0_7], %11 {strides = array<i32>} : memref<2x32xf32, #tpu.memory_space<vmem>>, vector<2x32xf32>,
    %c0_i32_8 = arith.constant 0 : i32
    %13 = arith.cmpi eq, %arg2, %c0_i32_8 : i32
    %14 = arith.extui %13 : i1 to i32
    %c0_i32_9 = arith.constant 0 : i32
    %15 = arith.cmpi ne, %14, %c0_i32_9 : i32
    scf.if %15 {
      %c0_10 = arith.constant 0 : index
      %c0_11 = arith.constant 0 : index
      %16 = vector.load %arg7[%c0_10, %c0_11] : memref<2x32xf32, #tpu.memory_space<vmem>>, vector<2x32xf32>
      %cst_12 = arith.constant 7.812500e-03 : f32
      %17 = vector.broadcast %cst_12 : f32 to vector<2x32xf32>
      %18 = arith.mulf %16, %17 : vector<2x32xf32>
      %19 = math.log %18 : vector<2x32xf32>
      %cst_13 = arith.constant 0.333333343 : f32
      %20 = vector.broadcast %cst_13 : f32 to vector<2x32xf32>
      %21 = arith.mulf %19, %20 : vector<2x32xf32>
      %22 = math.exp %21 : vector<2x32xf32>
      %c0_14 = arith.constant 0 : index
      %c0_15 = arith.constant 0 : index
      %23 = vector.load %arg4[%c0_14, %c0_15] : memref<1x32xf32, #tpu.memory_space<vmem>>, vector<1x32xf32>
      %24 = vector.broadcast %23 : vector<1x32xf32> to vector<2x32xf32>
      %25 = arith.mulf %22, %24 : vector<2x32xf32>
      %c0_16 = arith.constant 0 : index
      %c0_17 = arith.constant 0 : index
      %26 = vector.load %arg5[%c0_16, %c0_17] : memref<1x32xf32, #tpu.memory_space<vmem>>, vector<1x32xf32>
      %27 = vector.broadcast %26 : vector<1x32xf32> to vector<2x32xf32>
      %28 = arith.addf %25, %27 : vector<2x32xf32>
      %c0_18 = arith.constant 0 : index
      %c0_19 = arith.constant 0 : index
      %29 = vector.load %arg6[%c0_18, %c0_19] : memref<2x32xf32, #tpu.memory_space<vmem>>, vector<2x32xf32>
      tpu.vector_store %arg6[%c0_18, %c0_19], %28 {strides = array<i32>} : memref<2x32xf32, #tpu.memory_space<vmem>>, vector<2x32xf32>,
    } else {
    }
    return
  }
  func.func @transform_0(%arg0: i32, %arg1: i32, %arg2: i32) -> (i32, i32, i32) {
    %c0_i32 = arith.constant 0 : i32
    return %arg0, %arg2, %arg1 : i32, i32, i32
  }
  func.func @transform_1(%arg0: i32, %arg1: i32, %arg2: i32) -> (i32, i32) {
    %c0_i32 = arith.constant 0 : i32
    %c0_i32_0 = arith.constant 0 : i32
    return %c0_i32, %arg1 : i32, i32
  }
  func.func @transform_2(%arg0: i32, %arg1: i32, %arg2: i32) -> (i32, i32) {
    %c0_i32 = arith.constant 0 : i32
    %c0_i32_0 = arith.constant 0 : i32
    return %c0_i32, %arg1 : i32, i32
  }
  func.func @transform_3(%arg0: i32, %arg1: i32, %arg2: i32) -> (i32, i32) {
    %c0_i32 = arith.constant 0 : i32
    return %arg0, %arg1 : i32, i32
  }
}

</mosaic_0001>

<bundles_post_ra>
// kernel: tpu_custom_call.1
= control target key start
LH: loop header
LB: loop body
LE: loop exit
PB: predicated region body
PF: predicated region fallthrough
CT: control target
= control target key end

     0   :  { %vm19_vm0 = vcmask 254976   ;;  %v415_v0 = vmov 0.0   ;;  %s623_s0 = inlined_call_operand.vmem [shape: bf16[2,128,32], index: 0, kind: input, shape index: {}]   ;;  %s624_s1 = inlined_call_operand.vmem [shape: f32[1,32], index: 1, kind: input, shape index: {}]   ;;  %s625_s2 = inlined_call_operand.vmem [shape: f32[1,32], index: 2, kind: input, shape index: {}]   ;;  %s626_s3 = inlined_call_operand.hbm [shape: f32[2,32], index: 3, kind: output, shape index: {}]  }
   0x1   :  { %20 = vst.msk [vmem:[#allocation2] sm:$0x3] %vm19_vm0, %v415_v0 }
   0x2   :  { %8 = vsyncpa [#allocation4], 0  ;;  %v303_v1 = vld [vmem:[%s623_s0] sm:$0xff]   ;;  %v366_v2 = vld [vmem:[%s623_s0 + $0x8] sm:$0xff]   ;;  %vm182_vm1 = vcmask 261120   ;;  %vm259_vm2 = vcmask 1041409  }
   0x3   :  { %v367_v3 = vld [vmem:[%s623_s0 + $0x10] sm:$0xff]   ;;  %v368_v4 = vld [vmem:[%s623_s0 + $0x18] sm:$0xff]   ;;  %v369_v5 = vld [vmem:[%s623_s0 + $0x20] sm:$0xff]   ;;  %v304_v7 = vunpack.c.l.bf16 %v303_v1  ;;  %v305_v8 = vunpack.c.h.bf16 %v303_v1  ;;  %v308_v9 = vunpack.c.l.bf16 %v366_v2  ;;  %v309_v12 = vunpack.c.h.bf16 %v366_v2  ;;  %s416_s20 = smov [#allocation3]   ;;  %s293_s24 = sshll.u32 %s626_s3, 4  ;;  %s294_s24 = int_to_ptr.hbm [resolvable:$true] %s293_s24 }
   0x4   :  { %v370_v6 = vld [vmem:[%s623_s0 + $0x28] sm:$0xff]   ;;  %v371_v10 = vld [vmem:[%s623_s0 + $0x30] sm:$0xff]   ;;  %v372_v11 = vld [vmem:[%s623_s0 + $0x38] sm:$0xff]   ;;  %v312_v13 = vunpack.c.l.bf16 %v367_v3  ;;  %v313_v14 = vunpack.c.h.bf16 %v367_v3  ;;  %v316_v15 = vunpack.c.l.bf16 %v368_v4  ;;  %v317_v18 = vunpack.c.h.bf16 %v368_v4  ;;  %s291_s21 = sshll.u32 %s416_s20, 4  ;;  %s292_s21 = int_to_ptr.vmem [resolvable:$true] %s291_s21 }
   0x5   :  { %v373_v16 = vld [vmem:[%s623_s0 + $0x40] sm:$0xff]   ;;  %v374_v17 = vld [vmem:[%s623_s0 + $0x48] sm:$0xff]   ;;  %v320_v19 = vunpack.c.l.bf16 %v369_v5  ;;  %v321_v20 = vunpack.c.h.bf16 %v369_v5  ;;  %v324_v21 = vunpack.c.l.bf16 %v370_v6  ;;  %v375_v22 = vld [vmem:[%s623_s0 + $0x50] sm:$0xff]   ;;  %v325_v24 = vunpack.c.h.bf16 %v370_v6 }
   0x6   :  { %v376_v23 = vld [vmem:[%s623_s0 + $0x58] sm:$0xff]   ;;  %v328_v25 = vunpack.c.l.bf16 %v371_v10  ;;  %v329_v26 = vunpack.c.h.bf16 %v371_v10  ;;  %v332_v27 = vunpack.c.l.bf16 %v372_v11  ;;  %v377_v28 = vld [vmem:[%s623_s0 + $0x60] sm:$0xff]   ;;  %v333_v29 = vunpack.c.h.bf16 %v372_v11  ;;  %v378_v33 = vld [vmem:[%s623_s0 + $0x68] sm:$0xff]  }
   0x7   :  { %v336_v30 = vunpack.c.l.bf16 %v373_v16  ;;  %v337_v31 = vunpack.c.h.bf16 %v373_v16  ;;  %v340_v32 = vunpack.c.l.bf16 %v374_v17  ;;  %v379_v34 = vld [vmem:[%s623_s0 + $0x70] sm:$0xff]   ;;  %v341_v35 = vunpack.c.h.bf16 %v374_v17  ;;  %v486_v39 = vld [vmem:[%s623_s0 + $0x78] sm:$0xff]  }
   0x8   :  { %v344_v36 = vunpack.c.l.bf16 %v375_v22  ;;  %v345_v37 = vunpack.c.h.bf16 %v375_v22  ;;  %v348_v38 = vunpack.c.l.bf16 %v376_v23  ;;  %v349_v40 = vunpack.c.h.bf16 %v376_v23 }
   0x9   :  { %v352_v41 = vunpack.c.l.bf16 %v377_v28  ;;  %v353_v42 = vunpack.c.h.bf16 %v377_v28  ;;  %v85_v43 = vmax.f32 %v304_v7, 1e-06  ;;  %v356_v44 = vunpack.c.l.bf16 %v378_v33 }
   0xa   :  { %v357_v45 = vunpack.c.h.bf16 %v378_v33  ;;  %v360_v46 = vunpack.c.l.bf16 %v379_v34  ;;  %v86_v47 = vmax.f32 %v305_v8, 1e-06  ;;  %v361_v48 = vunpack.c.h.bf16 %v379_v34 }
   0xb   :  { %v364_v49 = vunpack.c.l.bf16 %v486_v39  ;;  %v87_v50 = vmax.f32 %v308_v9, 1e-06  ;;  %v88_v51 = vmax.f32 %v309_v12, 1e-06  ;;  %v365_v52 = vunpack.c.h.bf16 %v486_v39 }
   0xc   :  { %v89_v53 = vmax.f32 %v312_v13, 1e-06  ;;  %v90_v54 = vmax.f32 %v313_v14, 1e-06  ;;  %v91_v55 = vmax.f32 %v316_v15, 1e-06  ;;  %v117_v59 = vmul.f32 %v85_v43, %v85_v43 }
   0xd   :  { %v490_v56 = vmax.f32 %v317_v18, 1e-06  ;;  %v492_v57 = vmax.f32 %v320_v19, 1e-06  ;;  %v494_v58 = vmax.f32 %v321_v20, 1e-06  ;;  %v118_v63 = vmul.f32 %v86_v47, %v86_v47 }
   0xe   :  { %v496_v60 = vmax.f32 %v324_v21, 1e-06  ;;  %v498_v61 = vmax.f32 %v325_v24, 1e-06  ;;  %v500_v62 = vmax.f32 %v328_v25, 1e-06  ;;  %v119_v3 = vmul.f32 %v87_v50, %v87_v50 }
   0xf   :  { %v502_v0 = vmax.f32 %v329_v26, 1e-06  ;;  %v504_v1 = vmax.f32 %v332_v27, 1e-06  ;;  %v101_v2 = vmax.f32 %v336_v30, 1e-06  ;;  %v120_v7 = vmul.f32 %v88_v51, %v88_v51 }
  0x10   :  { %v506_v4 = vmax.f32 %v333_v29, 1e-06  ;;  %v102_v5 = vmax.f32 %v337_v31, 1e-06  ;;  %v103_v6 = vmax.f32 %v340_v32, 1e-06  ;;  %v121_v11 = vmul.f32 %v89_v53, %v89_v53 }
  0x11   :  { %v104_v8 = vmax.f32 %v341_v35, 1e-06  ;;  %v105_v9 = vmax.f32 %v344_v36, 1e-06  ;;  %v106_v10 = vmax.f32 %v345_v37, 1e-06  ;;  %v122_v15 = vmul.f32 %v90_v54, %v90_v54 }
  0x12   :  { %v107_v12 = vmax.f32 %v348_v38, 1e-06  ;;  %v508_v13 = vmax.f32 %v349_v40, 1e-06  ;;  %v510_v14 = vmax.f32 %v352_v41, 1e-06  ;;  %v133_v17 = vmul.f32 %v101_v2, %v101_v2 }
  0x13   :  { %v512_v16 = vmax.f32 %v353_v42, 1e-06  ;;  %v149_v18 = vmul.f32 %v117_v59, %v85_v43  ;;  %v150_v19 = vmul.f32 %v118_v63, %v86_v47  ;;  %v514_v20 = vmax.f32 %v356_v44, 1e-06 }
  0x14   :  { %v134_v21 = vmul.f32 %v102_v5, %v102_v5  ;;  %v135_v22 = vmul.f32 %v103_v6, %v103_v6  ;;  %v151_v23 = vmul.f32 %v119_v3, %v87_v50  ;;  %v516_v24 = vmax.f32 %v357_v45, 1e-06 }
  0x15   :  { %v518_v25 = vmax.f32 %v360_v46, 1e-06  ;;  %v123_v26 = vmul.f32 %v91_v55, %v91_v55  ;;  %v152_v27 = vmul.f32 %v120_v7, %v88_v51  ;;  %v520_v28 = vmax.f32 %v361_v48, 1e-06 }
  0x16   :  { %v124_v29 = vmul.f32 %v490_v56, %v490_v56  ;;  %v136_v30 = vmul.f32 %v104_v8, %v104_v8  ;;  %v137_v31 = vmul.f32 %v105_v9, %v105_v9  ;;  %v153_v32 = vmul.f32 %v121_v11, %v89_v53 }
  0x17   :  { %v165_v33 = vmul.f32 %v133_v17, %v101_v2  ;;  %v183_v34 = vsel %vm182_vm1, %v149_v18, 0.0  ;;  %v184_v35 = vsel %vm182_vm1, %v150_v19, 0.0  ;;  %v166_v36 = vmul.f32 %v134_v21, %v102_v5 }
  0x18   :  { %v167_v37 = vmul.f32 %v135_v22, %v103_v6  ;;  %v185_v38 = vadd.f32 %v184_v35, %v183_v34  ;;  %v186_v39 = vsel %vm182_vm1, %v151_v23, 0.0  ;;  %v527_v40 = vmax.f32 %v364_v49, 1e-06 }
  0x19   :  { %v529_v41 = vmax.f32 %v365_v52, 1e-06  ;;  %v154_v42 = vmul.f32 %v122_v15, %v90_v54  ;;  %v188_v43 = vsel %vm182_vm1, %v152_v27, 0.0  ;;  %v125_v44 = vmul.f32 %v492_v57, %v492_v57 }
  0x1a   :  { %v138_v45 = vmul.f32 %v106_v10, %v106_v10  ;;  %v168_v46 = vmul.f32 %v136_v30, %v104_v8  ;;  %v187_v47 = vadd.f32 %v186_v39, %v185_v38  ;;  %v139_v48 = vmul.f32 %v107_v12, %v107_v12 }
  0x1b   :  { %v155_v50 = vmul.f32 %v123_v26, %v91_v55  ;;  %v169_v51 = vmul.f32 %v137_v31, %v105_v9  ;;  %v190_v53 = vsel %vm182_vm1, %v153_v32, 0.0  ;;  %v220_v49 = vsel %vm182_vm1, %v165_v33, 0.0 }
  0x1c   :  { %v189_v59 = vadd.f32 %v188_v43, %v187_v47  ;;  %v221_v52 = vsel %vm182_vm1, %v166_v36, 0.0  ;;  %v223_v54 = vsel %vm182_vm1, %v167_v37, 0.0  ;;  %v126_v63 = vmul.f32 %v494_v58, %v494_v58 }
  0x1d   :  { %v156_v2 = vmul.f32 %v124_v29, %v490_v56  ;;  %v192_v3 = vsel %vm182_vm1, %v154_v42, 0.0  ;;  %v222_v5 = vadd.f32 %v221_v52, %v220_v49  ;;  %v140_v55 = vmul.f32 %v508_v13, %v508_v13 }
  0x1e   :  { %v170_v6 = vmul.f32 %v138_v45, %v106_v10  ;;  %v191_v7 = vadd.f32 %v190_v53, %v189_v59  ;;  %v225_v8 = vsel %vm182_vm1, %v168_v46, 0.0  ;;  %v127_v9 = vmul.f32 %v496_v60, %v496_v60 }
  0x1f   :  { %v157_v11 = vmul.f32 %v125_v44, %v492_v57  ;;  %v194_v15 = vsel %vm182_vm1, %v155_v50, 0.0  ;;  %v224_v17 = vadd.f32 %v223_v54, %v222_v5  ;;  %v141_v56 = vmul.f32 %v510_v14, %v510_v14 }
  0x20   :  { %v171_v18 = vmul.f32 %v139_v48, %v107_v12  ;;  %v193_v19 = vadd.f32 %v192_v3, %v191_v7  ;;  %v227_v21 = vsel %vm182_vm1, %v169_v51, 0.0  ;;  %v128_v10 = vmul.f32 %v498_v61, %v498_v61 }
  0x21   :  { %v158_v22 = vmul.f32 %v126_v63, %v494_v58  ;;  %v196_v23 = vsel %vm182_vm1, %v156_v2, 0.0  ;;  %v226_v26 = vadd.f32 %v225_v8, %v224_v17  ;;  %v142_v57 = vmul.f32 %v512_v16, %v512_v16 }
  0x22   :  { %v172_v27 = vmul.f32 %v140_v55, %v508_v13  ;;  %v195_v29 = vadd.f32 %v194_v15, %v193_v19  ;;  %v229_v30 = vsel %vm182_vm1, %v170_v6, 0.0  ;;  %v129_v12 = vmul.f32 %v500_v62, %v500_v62 }
  0x23   :  { %v159_v31 = vmul.f32 %v127_v9, %v496_v60  ;;  %v198_v32 = vsel %vm182_vm1, %v157_v11, 0.0  ;;  %v228_v33 = vadd.f32 %v227_v21, %v226_v26  ;;  %v143_v58 = vmul.f32 %v514_v20, %v514_v20 }
  0x24   :  { %v173_v34 = vmul.f32 %v141_v56, %v510_v14  ;;  %v197_v35 = vadd.f32 %v196_v23, %v195_v29  ;;  %v231_v36 = vsel %vm182_vm1, %v171_v18, 0.0  ;;  %v130_v13 = vmul.f32 %v502_v0, %v502_v0 }
  0x25   :  { %v160_v37 = vmul.f32 %v128_v10, %v498_v61  ;;  %v200_v38 = vsel %vm182_vm1, %v158_v22, 0.0  ;;  %v230_v39 = vadd.f32 %v229_v30, %v228_v33  ;;  %v144_v60 = vmul.f32 %v516_v24, %v516_v24 }
  0x26   :  { %v174_v42 = vmul.f32 %v142_v57, %v512_v16  ;;  %v199_v43 = vadd.f32 %v198_v32, %v197_v35  ;;  %v233_v44 = vsel %vm182_vm1, %v172_v27, 0.0  ;;  %v131_v14 = vmul.f32 %v504_v1, %v504_v1 }
  0x27   :  { %v161_v45 = vmul.f32 %v129_v12, %v500_v62  ;;  %v202_v46 = vsel %vm182_vm1, %v159_v31, 0.0  ;;  %v232_v47 = vadd.f32 %v231_v36, %v230_v39  ;;  %v145_v61 = vmul.f32 %v518_v25, %v518_v25 }
  0x28   :  { %v175_v48 = vmul.f32 %v143_v58, %v514_v20  ;;  %v201_v50 = vadd.f32 %v200_v38, %v199_v43  ;;  %v235_v51 = vsel %vm182_vm1, %v173_v34, 0.0  ;;  %v132_v16 = vmul.f32 %v506_v4, %v506_v4  ;;  %v181_v38 = vld [vmem:[#allocation2] sm:$0x3] }
  0x29   :  { %v162_v53 = vmul.f32 %v130_v13, %v502_v0  ;;  %v204_v59 = vsel %vm182_vm1, %v160_v37, 0.0  ;;  %v234_v49 = vadd.f32 %v233_v44, %v232_v47  ;;  %v146_v62 = vmul.f32 %v520_v28, %v520_v28 }
  0x2a   :  { %v176_v52 = vmul.f32 %v144_v60, %v516_v24  ;;  %v203_v54 = vadd.f32 %v202_v46, %v201_v50  ;;  %v237_v63 = vsel %vm182_vm1, %v174_v42, 0.0  ;;  %v163_v20 = vmul.f32 %v131_v14, %v504_v1 }
  0x2b   :  { %v206_v2 = vsel %vm182_vm1, %v161_v45, 0.0  ;;  %v236_v3 = vadd.f32 %v235_v51, %v234_v49  ;;  %v147_v5 = vmul.f32 %v527_v40, %v527_v40  ;;  %v177_v0 = vmul.f32 %v145_v61, %v518_v25  ;;  %v383_v61 = vld [vmem:[%s624_s1] ss:$0 sm:$0xff] }
  0x2c   :  { %v205_v55 = vadd.f32 %v204_v59, %v203_v54  ;;  %v239_v6 = vsel %vm182_vm1, %v175_v48, 0.0  ;;  %v164_v7 = vmul.f32 %v132_v16, %v506_v4  ;;  %v208_v24 = vsel %vm182_vm1, %v162_v53, 0.0  ;;  %v384_v48 = vld [vmem:[%s625_s2] ss:$0 sm:$0xff] }
  0x2d   :  { %v238_v8 = vadd.f32 %v237_v63, %v236_v3  ;;  %v148_v9 = vmul.f32 %v529_v41, %v529_v41  ;;  %v178_v1 = vmul.f32 %v146_v62, %v520_v28  ;;  %v241_v15 = vsel %vm182_vm1, %v176_v52, 0.0 }
  0x2e   :  { %v207_v11 = vadd.f32 %v206_v2, %v205_v55  ;;  %v210_v17 = vsel %vm182_vm1, %v163_v20, 0.0  ;;  %v179_v25 = vmul.f32 %v147_v5, %v527_v40  ;;  %v243_v19 = vsel %vm182_vm1, %v177_v0, 0.0 }
  0x2f   :  { %v240_v56 = vadd.f32 %v239_v6, %v238_v8  ;;  %v212_v4 = vsel %vm182_vm1, %v164_v7, 0.0  ;;  %v180_v10 = vmul.f32 %v148_v9, %v529_v41  ;;  %v245_v23 = vsel %vm182_vm1, %v178_v1, 0.0 }
  0x30   :  { %v209_v18 = vadd.f32 %v208_v24, %v207_v11  ;;  %v247_v57 = vsel %vm182_vm1, %v179_v25, 0.0 }
  0x31   :  { %v242_v21 = vadd.f32 %v241_v15, %v240_v56  ;;  %v249_v30 = vsel %vm182_vm1, %v180_v10, 0.0 }
  0x32   :  { %v211_v22 = vadd.f32 %v210_v17, %v209_v18 }
  0x33   :  { %v244_v28 = vadd.f32 %v243_v19, %v242_v21 }
  0x34   :  { %v213_v26 = vadd.f32 %v212_v4, %v211_v22 }
  0x35   :  { %v246_v27 = vadd.f32 %v245_v23, %v244_v28 }
  0x36   :  { %v214_v29 = vrot.slane %v213_v26, 4 }
  0x37   :  { %v248_v40 = vadd.f32 %v247_v57, %v246_v27 }
  0x38   :  { %v215_v12 = vadd.f32 %v214_v29, %v213_v26 }
  0x39   :  { %v250_v31 = vadd.f32 %v249_v30, %v248_v40 }
  0x3a   :  { %v216_v32 = vrot.slane %v215_v12, 2 }
  0x3b   :  { %v251_v33 = vrot.slane %v250_v31, 4 }
  0x3c   :  { %v217_v58 = vadd.f32 %v216_v32, %v215_v12 }
  0x3d   :  { %v252_v34 = vadd.f32 %v251_v33, %v250_v31 }
  0x3e   :  { %v218_v35 = vrot.slane %v217_v58, 1 }
  0x3f   :  { %v253_v41 = vrot.slane %v252_v34, 2 }
  0x40   :  { %v219_v13 = vadd.f32 %v218_v35, %v217_v58 }
  0x41   :  { %v254_v36 = vadd.f32 %v253_v41, %v252_v34 }
  0x43   :  { %v255_v37 = vrot.slane %v254_v36, 1 }
  0x45   :  { %v256_v39 = vadd.f32 %v255_v37, %v254_v36 }
  0x47   :  { %v260_v60 = vsel %vm259_vm2, %v256_v39, %v219_v13 }
  0x48   :  { %v262_v42 = vadd.f32 %v260_v60, %v181_v38 }
  0x4a   :  { %264 = vst.msk [vmem:[#allocation2] sm:$0x3] %vm19_vm0, %v262_v42 }
  0x51   :  { %v268_v43 = vld [vmem:[#allocation2] sm:$0x3] }
  0x52   :  { %v269_v44 = vmul.f32 0.0078125, %v268_v43 }
  0x54   :  { %385 = vlog2.f32 %v269_v44 }
  0x5a   :  { %v386_v14 = vpop.eup %385 }
  0x5b   :  { %v271_v45 = vmul.f32 0.6931472, %v386_v14 }
  0x5d   :  { %v272_v46 = vmul.f32 0.33333334, %v271_v45 }
  0x5f   :  { %v273_v47 = vmul.f32 1.442695, %v272_v46 }
  0x61   :  { %387 = vpow2.f32 %v273_v47 }
  0x67   :  { %v388_v50 = vpop.eup %387 }
  0x68   :  { %v279_v51 = vmul.f32 %v388_v50, %v383_v61 }
  0x6a   :  { %v284_v16 = vadd.f32 %v384_v48, %v279_v51 }
  0x6c   :  { %285 = vst.msk [vmem:[#allocation3] sm:$0x3] %vm19_vm0, %v284_v16 }
  0x6d   :  { %296 = dma.vmem_to_hbm [thread:$0]  %s292_s21, 32, %s294_s24, [#allocation4]  }
  0x6e   :  { %413 = dma.done.wait [#allocation4], 32  }
  0x6f   :  { %414 = vsyncadd [#allocation4], 4294967264 }
  0x70   :  { %301 = vsyncpa [#allocation4], 1 }

</bundles_post_ra>
